<compile_context>
chip_gen: v5e
topology: v5e:2x2
jax: 0.10.0
libtpu: 0.0.40
codegen_flags: <defaults>
</compile_context>

<pallas_src>
import functools
import math

import jax
import jax.numpy as jnp
from jax.experimental import pallas as pl
from jax.experimental.pallas import tpu as pltpu


def _conv_gemm_kernel(p_ref, w_ref, b_ref, o_ref):
    """One grid step: out(Cout, LT) = relu(W(Cout, Kp) @ P(Kp, LT) + b).

    p_ref : (Kp, LT)  im2col patch block (auto-pipelined, compute_dtype)
    w_ref : (Cout, Kp) weights (VMEM-resident, compute_dtype)
    b_ref : (Cout, 1)  bias (VMEM-resident, float32)
    o_ref : (Cout, LT) output block (float32)
    """
    acc = jnp.dot(w_ref[...], p_ref[...], preferred_element_type=jnp.float32)
    # Bias + ReLU in f32 on the VPU, then one bulk lane-dense store.
    o_ref[...] = jnp.maximum(acc + b_ref[...], 0.0).astype(o_ref.dtype)


def _round_up(v, m):
    return -(-v // m) * m


def f_conv_layer(x, weight, bias, stride=1, *, lane_tile=512,
                 compute_dtype=jnp.float32):
    """f_ConvLayer.forward: ReflectionPad2d(k//2) -> Conv2d(k, stride) -> ReLU.

    x: (N, Cin, H, W); weight: (Cout, Cin, kh, kw) (PyTorch OIHW); bias: (Cout,).
    Returns (N, Cout, Hout, Wout) float32.
    """
    N, Cin, H, W = x.shape
    Cout, Cin_w, kh, kw = weight.shape
    assert Cin == Cin_w
    pad = kh // 2                                   # int(np.floor(kernel_size / 2))

    # ---------------- XLA-side layout plumbing: reflect pad + strided im2col ------------
    xp = x
    if pad > 0:
        xp = jnp.pad(x, ((0, 0), (0, 0), (pad, pad), (pad, pad)), mode="reflect")
    Hp, Wp = xp.shape[2], xp.shape[3]
    Hout = (Hp - kh) // stride + 1
    Wout = (Wp - kw) // stride + 1

    cols = []
    for dy in range(kh):
        for dx in range(kw):
            cols.append(xp[:, :,
                           dy:dy + (Hout - 1) * stride + 1:stride,
                           dx:dx + (Wout - 1) * stride + 1:stride])   # (N, Cin, Hout, Wout)
    K = kh * kw * Cin
    L = Hout * Wout
    # rows ordered (dy, dx, ci); lanes ordered (y, x)
    patches = jnp.stack(cols, axis=1).reshape(N, K, L)

    # Pad K to a sublane multiple and L to a lane-tile multiple (zero fill; padded lanes
    # produce relu(bias) garbage that is sliced off below).
    Kp = _round_up(K, 8)
    LT = _round_up(min(lane_tile, L), 128)
    num_lt = pl.cdiv(L, LT)
    Lpad = num_lt * LT
    patches = jnp.pad(patches, ((0, 0), (0, Kp - K), (0, Lpad - L))).astype(compute_dtype)

    # Raw weights -> (Cout, Kp) matching the patch-row ordering (dy, dx, ci).
    w2 = jnp.transpose(weight, (0, 2, 3, 1)).reshape(Cout, K)
    w2 = jnp.pad(w2, ((0, 0), (0, Kp - K))).astype(compute_dtype)
    b2 = bias.reshape(Cout, 1).astype(jnp.float32)

    itemsize = jnp.dtype(compute_dtype).itemsize
    cost = pl.CostEstimate(
        flops=2 * N * Cout * Kp * Lpad,
        transcendentals=0,
        bytes_accessed=(N * Kp * Lpad * itemsize           # patch reads
                        + Cout * Kp * itemsize + Cout * 4  # resident params
                        + N * Cout * Lpad * 4))            # output writes

    out = pl.pallas_call(
        _conv_gemm_kernel,
        grid=(N, num_lt),
        in_specs=[
            pl.BlockSpec((None, Kp, LT), lambda n, t: (n, 0, t)),    # patches (pipelined)
            pl.BlockSpec((Cout, Kp), lambda n, t: (0, 0)),           # weights (resident)
            pl.BlockSpec((Cout, 1), lambda n, t: (0, 0)),            # bias (resident)
        ],
        out_specs=pl.BlockSpec((None, Cout, LT), lambda n, t: (n, 0, t)),
        out_shape=jax.ShapeDtypeStruct((N, Cout, Lpad), jnp.float32),
        compiler_params=pltpu.CompilerParams(
            dimension_semantics=("parallel", "parallel")),
        cost_estimate=cost,
    )(patches, w2, b2)

    return out[:, :, :L].reshape(N, Cout, Hout, Wout)


def _init_conv_params(key, cout, cin, k):
    """Deterministic PyTorch-style uniform(-1/sqrt(fan_in), 1/sqrt(fan_in)) init."""
    kw_, kb_ = jax.random.split(key)
    fan_in = cin * k * k
    bound = 1.0 / math.sqrt(fan_in)
    w = jax.random.uniform(kw_, (cout, cin, k, k), jnp.float32, -bound, bound)
    b = jax.random.uniform(kb_, (cout,), jnp.float32, -bound, bound)
    return w, b


if __name__ == "__main__":
    in_channels, out_channels, kernel_size, stride = 4, 8, 3, 1

    key = jax.random.PRNGKey(0)
    kp_, kx_ = jax.random.split(key)
    w, b = _init_conv_params(kp_, out_channels, in_channels, kernel_size)
    x = jax.random.normal(kx_, (2, in_channels, 16, 16), jnp.float32)

    fwd = jax.jit(f_conv_layer, static_argnames=("stride", "lane_tile", "compute_dtype"))
    out = fwd(x, w, b, stride=stride)
    jax.block_until_ready(out)
    assert out.shape == (2, out_channels, 16, 16), out.shape

    # Self-check against a pure-XLA reference: reflect-pad -> VALID conv -> bias -> ReLU.
    pad = kernel_size // 2
    x_pad = jnp.pad(x, ((0, 0), (0, 0), (pad, pad), (pad, pad)), mode="reflect")
    ref = jax.lax.conv_general_dilated(
        x_pad, w, window_strides=(stride, stride), padding="VALID",
        dimension_numbers=("NCHW", "OIHW", "NCHW"))
    ref = jnp.maximum(ref + b[None, :, None, None], 0.0)

    err_f32 = float(jnp.max(jnp.abs(out - ref)))
    assert err_f32 < 1e-4, f"f32 max abs err {err_f32}"

    # bf16 compute path (recommended on v6e/v7x): bf16 inputs/weights, f32 accumulate/bias/ReLU.
    out_bf16 = fwd(x, w, b, stride=stride, compute_dtype=jnp.bfloat16)
    jax.block_until_ready(out_bf16)
    err_bf16 = float(jnp.max(jnp.abs(out_bf16 - ref)))
    assert err_bf16 < 5e-2, f"bf16 max abs err {err_bf16}"

    print("KERNEL_OK")
</pallas_src>

<mosaic_0001>
module attributes {stable_mosaic.version = 11 : i64} {
  func.func @_conv_gemm_kernel(%arg0: i32, %arg1: i32, %arg2: memref<1x40x256xf32, #tpu.memory_space<vmem>>, %arg3: memref<8x40xf32, #tpu.memory_space<vmem>>, %arg4: memref<8x1xf32, #tpu.memory_space<vmem>>, %arg5: memref<1x8x256xf32, #tpu.memory_space<vmem>>) attributes {dimension_semantics = [#tpu.dimension_semantics<parallel>, #tpu.dimension_semantics<parallel>], iteration_bounds = array<i64: 2, 1>, scalar_prefetch = 0 : i64, scratch_operands = 0 : i64, tpu.core_type = #tpu.core_type<tc>, window_params = [{transform_indices = @transform_0, window_bounds = array<i64: 1, 40, 256>}, {pipeline_mode = #tpu.pipeline_mode<synchronous>, transform_indices = @transform_1, window_bounds = array<i64: 8, 40>}, {pipeline_mode = #tpu.pipeline_mode<synchronous>, transform_indices = @transform_2, window_bounds = array<i64: 8, 1>}, {transform_indices = @transform_3, window_bounds = array<i64: 1, 8, 256>}]} {
    %c0 = arith.constant 0 : index
    %c0_0 = arith.constant 0 : index
    %0 = vector.load %arg3[%c0, %c0_0] : memref<8x40xf32, #tpu.memory_space<vmem>>, vector<8x40xf32>
    %c0_1 = arith.constant 0 : index
    %c0_2 = arith.constant 0 : index
    %c0_3 = arith.constant 0 : index
    %1 = vector.load %arg2[%c0_1, %c0_2, %c0_3] : memref<1x40x256xf32, #tpu.memory_space<vmem>>, vector<1x40x256xf32>
    %2 = vector.shape_cast %1 : vector<1x40x256xf32> to vector<40x256xf32>
    %cst = arith.constant dense<0.000000e+00> : vector<8x256xf32>
    %3 = tpu.matmul %0, %2, %cst {dimension_numbers = #tpu.dot_dimension_numbers<[1], [0], [0], [1], [0, 0, 1, 1], [], []>} : vector<8x40xf32>, vector<40x256xf32>, vector<8x256xf32> -> vector<8x256xf32>
    %c0_4 = arith.constant 0 : index
    %c0_5 = arith.constant 0 : index
    %4 = vector.load %arg4[%c0_4, %c0_5] : memref<8x1xf32, #tpu.memory_space<vmem>>, vector<8x1xf32>
    %5 = vector.broadcast %4 : vector<8x1xf32> to vector<8x256xf32>
    %6 = arith.addf %3, %5 : vector<8x256xf32>
    %cst_6 = arith.constant 0.000000e+00 : f32
    %7 = vector.broadcast %cst_6 : f32 to vector<8x256xf32>
    %8 = arith.maximumf %6, %7 : vector<8x256xf32>
    %c0_7 = arith.constant 0 : index
    %c0_8 = arith.constant 0 : index
    %c0_9 = arith.constant 0 : index
    %9 = vector.load %arg5[%c0_7, %c0_8, %c0_9] : memref<1x8x256xf32, #tpu.memory_space<vmem>>, vector<1x8x256xf32>
    %10 = vector.shape_cast %9 : vector<1x8x256xf32> to vector<8x256xf32>
    %11 = vector.shape_cast %8 : vector<8x256xf32> to vector<1x8x256xf32>
    tpu.vector_store %arg5[%c0_7, %c0_8, %c0_9], %11 {strides = array<i32>} : memref<1x8x256xf32, #tpu.memory_space<vmem>>, vector<1x8x256xf32>,
    return
  }
  func.func @transform_0(%arg0: i32, %arg1: i32) -> (i32, i32, i32) {
    %c0_i32 = arith.constant 0 : i32
    %c0_i32_0 = arith.constant 0 : i32
    return %arg0, %c0_i32, %arg1 : i32, i32, i32
  }
  func.func @transform_1(%arg0: i32, %arg1: i32) -> (i32, i32) {
    %c0_i32 = arith.constant 0 : i32
    %c0_i32_0 = arith.constant 0 : i32
    %c0_i32_1 = arith.constant 0 : i32
    return %c0_i32, %c0_i32_0 : i32, i32
  }
  func.func @transform_2(%arg0: i32, %arg1: i32) -> (i32, i32) {
    %c0_i32 = arith.constant 0 : i32
    %c0_i32_0 = arith.constant 0 : i32
    %c0_i32_1 = arith.constant 0 : i32
    return %c0_i32, %c0_i32_0 : i32, i32
  }
  func.func @transform_3(%arg0: i32, %arg1: i32) -> (i32, i32, i32) {
    %c0_i32 = arith.constant 0 : i32
    %c0_i32_0 = arith.constant 0 : i32
    return %arg0, %c0_i32, %arg1 : i32, i32, i32
  }
}

</mosaic_0001>

<bundles_post_ra>
// kernel: f_conv_layer.1
= control target key start
LH: loop header
LB: loop body
LE: loop exit
PB: predicated region body
PF: predicated region fallthrough
CT: control target
= control target key end

     0   :  { %s447_s12 = smov 0   ;;  %s449_s13 = smov 0   ;;  %s490_s0 = inlined_call_operand.vmem [shape: f32[2,40,256], index: 0, kind: input, shape index: {}]   ;;  %s491_s1 = inlined_call_operand.vmem [shape: f32[8,40], index: 1, kind: input, shape index: {}]   ;;  %s492_s2 = inlined_call_operand.vmem [shape: f32[8,1], index: 2, kind: input, shape index: {}]   ;;  %s493_s3 = inlined_call_operand.vmem [shape: f32[2,8,256], index: 3, kind: output, shape index: {}]  }
   0x1   :  { %s451_s14 = smov 0  }
   0x2 LB: > { %s25_s15 = sadd.s32 1, %s420_s13  ;;  %p366_p0 = scmp.ge.s32.totalorder %s424_s14, 1  ;;  %s424_s14 = sphi %s451_s14, %s13_s14   ;;  %s420_s13 = sphi %s449_s13, %s495_s13   ;;  %s416_s12 = sphi %s447_s12, %s494_s12  }
   0x3   : > { %p27_p1 = scmp.ge.s32.totalorder %s25_s15, 2  ;;  %p158_p2 = scmp.lt.s32.totalorder %s424_s14, 3 }
   0x5   : > { %s497_s15 = smov (%p27_p1, %s25_s15), 0  ;;  %p159_p3 = pnand %p366_p0, %p158_p2 }
   0x6   : > { %p191_p4 = scmp.lt.s32.totalorder (!%p159_p3), %s416_s12, 1 }
   0x7   : > { %162 = sbr.rel (%p159_p3) target bundleno = 158 (0x9e), region = 32 }
   0xc   : > { %v221_v0 = vld [vmem:[%s492_s2] sm:$0xff]  ;;  %v426_v1 = vmov 0   ;;  %s499_s12 = smov (!%p191_p4, %s416_s12), 1  ;;  %vm227_vm0 = vcmask 326656  }
   0xd   : > { %401 = vset.pattern.permute.xlu0 %v426_v1  ;;  %s375_s18 = smul.u32 80, %s499_s12  ;;  %v210_v12 = vld [vmem:[%s491_s1] sm:$0xff]  ;;  %s374_s24 = sshll.u32 %s499_s12, 4 }
   0xe   : > { %224 = vperm.xlu0 %401, %v221_v0   ;;  %s208_s27 = scalar_lea.vmem %s493_s3, %s374_s24 }
   0xf   : > { %s198_s21 = scalar_lea.vmem %s490_s0, %s375_s18 }
  0x10   : > { %v219_v2 = vld [vmem:[%s198_s21 + $0x40] sm:$0xff]  ;;  %v220_v3 = vld [vmem:[%s198_s21 + $0x48] sm:$0xff]  ;;  %v217_v4 = vld [vmem:[%s198_s21 + $0x30] sm:$0xff] }
  0x11   : > { %242 = vmatpush.msra.mxu0 %v219_v2  ;;  %262 = vmatpush.msra.mxu1 %v220_v3  ;;  %v218_v5 = vld [vmem:[%s198_s21 + $0x38] sm:$0xff]  ;;  %v215_v6 = vld [vmem:[%s198_s21 + $0x20] sm:$0xff]  ;;  %v216_v7 = vld [vmem:[%s198_s21 + $0x28] sm:$0xff] }
  0x12   : > { %v213_v8 = vld [vmem:[%s198_s21 + $0x10] sm:$0xff]  ;;  %v214_v9 = vld [vmem:[%s198_s21 + $0x18] sm:$0xff]  ;;  %v211_v10 = vld [vmem:[%s198_s21] sm:$0xff] }
  0x13   : > { %243 = vmatpush.msra.mxu0 %v217_v4  ;;  %263 = vmatpush.msra.mxu1 %v218_v5  ;;  %v212_v11 = vld [vmem:[%s198_s21 + $0x8] sm:$0xff] }
  0x15   : > { %244 = vmatpush.msra.mxu0 %v215_v6  ;;  %264 = vmatpush.msra.mxu1 %v216_v7 }
  0x17   : > { %245 = vmatpush.msra.mxu0 %v213_v8  ;;  %265 = vmatpush.msra.mxu1 %v214_v9 }
  0x19   : > { %246 = vmatpush.msra.mxu0 %v211_v10  ;;  %266 = vmatpush.msra.mxu1 %v212_v11 }
  0x1a   : > { %370 = vmatmul.msk.f32.vlgmr.msra.gmra.mxu0 %vm227_vm0, %v210_v12  ;;  %371 = vmatmul.msk.f32.vlgmr.msra.gmra.mxu1 %vm227_vm0, %v210_v12 }
  0x80   : > { %v225_v13 = vpop.permute.xlu0 %224 }
  0x97   : > { %v248_v14 = vpop.f32.mrf.mxu0  ;;  %v268_v15 = vpop.f32.mrf.mxu1 }
  0x98   : > { %v249_v16 = vadd.f32 %v248_v14, %v225_v13  ;;  %v269_v17 = vadd.f32 %v268_v15, %v225_v13 }
  0x9a   : > { %v271_v18 = vmax.f32 %v249_v16, 0.0  ;;  %v272_v19 = vmax.f32 %v269_v17, 0.0 }
  0x9c   : > { %273 = vst [vmem:[%s208_s27] sm:$0xff] %v271_v18 }
  0x9d   : > { %274 = vst [vmem:[%s208_s27 + $0x8] sm:$0xff] %v272_v19 }
  0x9e PF: > { %s13_s14 = sadd.s32 1, %s424_s14   ;;  %s494_s12 = smov %s420_s13 }
  0x9f   : > { %p10_p5 = scmp.ge.s32.totalorder %s13_s14, 4   ;;  %s495_s13 = smov %s497_s15 }
  0xa1   :  { %12 = sbr.rel (!%p10_p5) target bundleno = 2 (0x2), region = 62 }

</bundles_post_ra>
